<compile_context>
chip_gen: v7x
topology: tpu7x:2x2x1
jax: 0.10.0
libtpu: 0.0.40
codegen_flags: <defaults>
</compile_context>

<pallas_src>
import functools

import jax
import jax.numpy as jnp
from jax.experimental import pallas as pl
from jax.experimental.pallas import tpu as pltpu

DROPOUT_P = 0.3
LANE = 128
SUBLANE = 8


def _round_up(x, m):
    return ((x + m - 1) // m) * m


def _pad2d(x, rows, cols):
    return jnp.pad(x, ((0, rows - x.shape[0]), (0, cols - x.shape[1])))


def _cbow_kernel(*refs, train):
    """Fused: (optional dropout-mask multiply) -> encoder linear -> decoder linear."""
    if train:
        (h_ref, mask_ref, w_enc_ref, b_enc_ref, w_dec_ref, b_dec_ref,
         dech_ref, ench_ref) = refs
    else:
        (h_ref, w_enc_ref, b_enc_ref, w_dec_ref, b_dec_ref,
         dech_ref, ench_ref) = refs

    h = h_ref[...]                                    # (TM, K) f32
    if train:
        # Inverted dropout; mask already contains keep * 1/(1-p) -> one vmul.
        h = h * mask_ref[...]

    # Encoder: (TM, K) @ (K, Ep) + (1, Ep)  -- lane-dense Ep = 128*n
    ench = jnp.dot(h, w_enc_ref[...], preferred_element_type=jnp.float32)
    ench = ench + b_enc_ref[...]
    ench_ref[...] = ench

    # Decoder: (TM, Ep) @ (Ep, Vp) + (1, Vp) -- lane-dense Vp = 128*n
    dech = jnp.dot(ench, w_dec_ref[...], preferred_element_type=jnp.float32)
    dech_ref[...] = dech + b_dec_ref[...]


def cbow_forward(context_vecs, w_enc, b_enc, w_dec, b_dec, *, train,
                 rng_key=None):
    """context_vecs: (B, num_context, vdim) float32.

    Weights stored as (in_features, out_features) (transposed vs nn.Linear).
    Dropout RNG stream differs from PyTorch's (distributionally equivalent).
    """
    B = context_vecs.shape[0]
    h = context_vecs.reshape(B, -1).astype(jnp.float32)       # (B, K)
    K = h.shape[1]
    E = w_enc.shape[1]
    V = w_dec.shape[1]

    # Lane-dense padded feature dims; batch tile a multiple of the sublane.
    E_pad = _round_up(E, LANE)
    V_pad = _round_up(V, LANE)
    tm = 128 if B >= 128 else _round_up(B, SUBLANE)
    nb = pl.cdiv(B, tm)
    B_pad = nb * tm

    h_p = _pad2d(h, B_pad, K)
    w_enc_p = _pad2d(w_enc.astype(jnp.float32), K, E_pad)
    b_enc_p = _pad2d(b_enc.reshape(1, E).astype(jnp.float32), 1, E_pad)
    w_dec_p = _pad2d(w_dec.astype(jnp.float32), E_pad, V_pad)
    b_dec_p = _pad2d(b_dec.reshape(1, V).astype(jnp.float32), 1, V_pad)

    h_spec = pl.BlockSpec((tm, K), lambda i: (i, 0))
    w_enc_spec = pl.BlockSpec((K, E_pad), lambda i: (0, 0))      # resident
    b_enc_spec = pl.BlockSpec((1, E_pad), lambda i: (0, 0))      # resident
    w_dec_spec = pl.BlockSpec((E_pad, V_pad), lambda i: (0, 0))  # resident
    b_dec_spec = pl.BlockSpec((1, V_pad), lambda i: (0, 0))      # resident

    if train:
        if rng_key is None:
            raise ValueError("rng_key is required when train=True")
        keep = jax.random.bernoulli(rng_key, 1.0 - DROPOUT_P, (B_pad, K))
        mask = keep.astype(jnp.float32) * (1.0 / (1.0 - DROPOUT_P))
        inputs = (h_p, mask, w_enc_p, b_enc_p, w_dec_p, b_dec_p)
        in_specs = [h_spec, h_spec, w_enc_spec, b_enc_spec,
                    w_dec_spec, b_dec_spec]
    else:
        inputs = (h_p, w_enc_p, b_enc_p, w_dec_p, b_dec_p)
        in_specs = [h_spec, w_enc_spec, b_enc_spec, w_dec_spec, b_dec_spec]

    kernel = functools.partial(_cbow_kernel, train=train)

    dech_p, ench_p = pl.pallas_call(
        kernel,
        grid=(nb,),
        in_specs=in_specs,
        out_specs=[
            pl.BlockSpec((tm, V_pad), lambda i: (i, 0)),   # dech
            pl.BlockSpec((tm, E_pad), lambda i: (i, 0)),   # ench
        ],
        out_shape=[
            jax.ShapeDtypeStruct((B_pad, V_pad), jnp.float32),
            jax.ShapeDtypeStruct((B_pad, E_pad), jnp.float32),
        ],
        compiler_params=pltpu.CompilerParams(
            dimension_semantics=("parallel",)),
    )(*inputs)

    dech = dech_p[:B, :V]
    ench = ench_p[:B, :E]
    # .squeeze() as in the PyTorch module (drops batch dim when B == 1).
    return jnp.squeeze(dech), jnp.squeeze(ench)


def init_params(key, vdim, encdim, num_context):
    """Deterministic synthetic params (shapes per the module's __init__)."""
    k1, k2, k3, k4, k5, k6 = jax.random.split(key, 6)
    K = vdim * num_context
    # Stored as (in_features, out_features) -- transposed vs. torch.nn.Linear.
    w_train = jax.random.normal(k1, (K, encdim), jnp.float32) * 0.05
    b_train = jax.random.normal(k2, (encdim,), jnp.float32) * 0.05
    w_test = jax.random.normal(k3, (K, encdim), jnp.float32) * 0.05
    b_test = jax.random.normal(k4, (encdim,), jnp.float32) * 0.05
    w_dec = jax.random.normal(k5, (encdim, vdim), jnp.float32) * 0.05
    b_dec = jax.random.normal(k6, (vdim,), jnp.float32) * 0.05
    return (w_train, b_train), (w_test, b_test), (w_dec, b_dec)


if __name__ == "__main__":
    B, NUM_CONTEXT, VDIM, ENCDIM = 8, 4, 32, 32

    key = jax.random.PRNGKey(0)
    k_x, k_p, k_drop = jax.random.split(key, 3)
    context_vecs = jax.random.normal(k_x, (B, NUM_CONTEXT, VDIM), jnp.float32)

    (w_tr, b_tr), (w_te, b_te), (w_dec, b_dec) = init_params(
        k_p, VDIM, ENCDIM, NUM_CONTEXT)

    # Eval path (test_encoder, no dropout) -- deterministic, check vs pure JAX.
    dech_eval, ench_eval = cbow_forward(
        context_vecs, w_te, b_te, w_dec, b_dec, train=False)
    jax.block_until_ready((dech_eval, ench_eval))

    h_ref = context_vecs.reshape(B, -1)
    ench_ref = h_ref @ w_te + b_te
    dech_ref = ench_ref @ w_dec + b_dec
    assert jnp.allclose(ench_eval, ench_ref, atol=1e-4, rtol=1e-4)
    assert jnp.allclose(dech_eval, dech_ref, atol=1e-4, rtol=1e-4)

    # Train path (train_encoder with fused inverted-dropout mask).
    dech_tr, ench_tr = cbow_forward(
        context_vecs, w_tr, b_tr, w_dec, b_dec, train=True, rng_key=k_drop)
    jax.block_until_ready((dech_tr, ench_tr))
    assert dech_tr.shape == (B, VDIM) and ench_tr.shape == (B, ENCDIM)
    assert bool(jnp.all(jnp.isfinite(dech_tr)))
    assert bool(jnp.all(jnp.isfinite(ench_tr)))

    print("KERNEL_OK")
</pallas_src>

<mosaic_0001>
module attributes {stable_mosaic.version = 11 : i64} {
  func.func @_cbow_kernel(%arg0: i32, %arg1: memref<8x128xf32, #tpu.memory_space<vmem>>, %arg2: memref<128x128xf32, #tpu.memory_space<vmem>>, %arg3: memref<1x128xf32, #tpu.memory_space<vmem>>, %arg4: memref<128x128xf32, #tpu.memory_space<vmem>>, %arg5: memref<1x128xf32, #tpu.memory_space<vmem>>, %arg6: memref<8x128xf32, #tpu.memory_space<vmem>>, %arg7: memref<8x128xf32, #tpu.memory_space<vmem>>) attributes {dimension_semantics = [#tpu.dimension_semantics<parallel>], iteration_bounds = array<i64: 1>, scalar_prefetch = 0 : i64, scratch_operands = 0 : i64, tpu.core_type = #tpu.core_type<tc>, window_params = [{transform_indices = @transform_0, window_bounds = array<i64: 8, 128>}, {pipeline_mode = #tpu.pipeline_mode<synchronous>, transform_indices = @transform_1, window_bounds = array<i64: 128, 128>}, {pipeline_mode = #tpu.pipeline_mode<synchronous>, transform_indices = @transform_2, window_bounds = array<i64: 1, 128>}, {pipeline_mode = #tpu.pipeline_mode<synchronous>, transform_indices = @transform_3, window_bounds = array<i64: 128, 128>}, {pipeline_mode = #tpu.pipeline_mode<synchronous>, transform_indices = @transform_4, window_bounds = array<i64: 1, 128>}, {transform_indices = @transform_5, window_bounds = array<i64: 8, 128>}, {transform_indices = @transform_6, window_bounds = array<i64: 8, 128>}]} {
    %c0 = arith.constant 0 : index
    %c0_0 = arith.constant 0 : index
    %0 = vector.load %arg1[%c0, %c0_0] : memref<8x128xf32, #tpu.memory_space<vmem>>, vector<8x128xf32>
    %c0_1 = arith.constant 0 : index
    %c0_2 = arith.constant 0 : index
    %1 = vector.load %arg2[%c0_1, %c0_2] : memref<128x128xf32, #tpu.memory_space<vmem>>, vector<128x128xf32>
    %cst = arith.constant dense<0.000000e+00> : vector<8x128xf32>
    %2 = tpu.matmul %0, %1, %cst {dimension_numbers = #tpu.dot_dimension_numbers<[1], [0], [0], [1], [0, 0, 1, 1], [], []>} : vector<8x128xf32>, vector<128x128xf32>, vector<8x128xf32> -> vector<8x128xf32>
    %c0_3 = arith.constant 0 : index
    %c0_4 = arith.constant 0 : index
    %3 = vector.load %arg3[%c0_3, %c0_4] : memref<1x128xf32, #tpu.memory_space<vmem>>, vector<1x128xf32>
    %4 = vector.broadcast %3 : vector<1x128xf32> to vector<8x128xf32>
    %5 = arith.addf %2, %4 : vector<8x128xf32>
    %c0_5 = arith.constant 0 : index
    %c0_6 = arith.constant 0 : index
    %6 = vector.load %arg7[%c0_5, %c0_6] : memref<8x128xf32, #tpu.memory_space<vmem>>, vector<8x128xf32>
    tpu.vector_store %arg7[%c0_5, %c0_6], %5 {strides = array<i32>} : memref<8x128xf32, #tpu.memory_space<vmem>>, vector<8x128xf32>,
    %c0_7 = arith.constant 0 : index
    %c0_8 = arith.constant 0 : index
    %7 = vector.load %arg4[%c0_7, %c0_8] : memref<128x128xf32, #tpu.memory_space<vmem>>, vector<128x128xf32>
    %cst_9 = arith.constant dense<0.000000e+00> : vector<8x128xf32>
    %8 = tpu.matmul %5, %7, %cst_9 {dimension_numbers = #tpu.dot_dimension_numbers<[1], [0], [0], [1], [0, 0, 1, 1], [], []>} : vector<8x128xf32>, vector<128x128xf32>, vector<8x128xf32> -> vector<8x128xf32>
    %c0_10 = arith.constant 0 : index
    %c0_11 = arith.constant 0 : index
    %9 = vector.load %arg5[%c0_10, %c0_11] : memref<1x128xf32, #tpu.memory_space<vmem>>, vector<1x128xf32>
    %10 = vector.broadcast %9 : vector<1x128xf32> to vector<8x128xf32>
    %11 = arith.addf %8, %10 : vector<8x128xf32>
    %c0_12 = arith.constant 0 : index
    %c0_13 = arith.constant 0 : index
    %12 = vector.load %arg6[%c0_12, %c0_13] : memref<8x128xf32, #tpu.memory_space<vmem>>, vector<8x128xf32>
    tpu.vector_store %arg6[%c0_12, %c0_13], %11 {strides = array<i32>} : memref<8x128xf32, #tpu.memory_space<vmem>>, vector<8x128xf32>,
    return
  }
  func.func @transform_0(%arg0: i32) -> (i32, i32) {
    %c0_i32 = arith.constant 0 : i32
    %c0_i32_0 = arith.constant 0 : i32
    return %arg0, %c0_i32 : i32, i32
  }
  func.func @transform_1(%arg0: i32) -> (i32, i32) {
    %c0_i32 = arith.constant 0 : i32
    %c0_i32_0 = arith.constant 0 : i32
    %c0_i32_1 = arith.constant 0 : i32
    return %c0_i32, %c0_i32_0 : i32, i32
  }
  func.func @transform_2(%arg0: i32) -> (i32, i32) {
    %c0_i32 = arith.constant 0 : i32
    %c0_i32_0 = arith.constant 0 : i32
    %c0_i32_1 = arith.constant 0 : i32
    return %c0_i32, %c0_i32_0 : i32, i32
  }
  func.func @transform_3(%arg0: i32) -> (i32, i32) {
    %c0_i32 = arith.constant 0 : i32
    %c0_i32_0 = arith.constant 0 : i32
    %c0_i32_1 = arith.constant 0 : i32
    return %c0_i32, %c0_i32_0 : i32, i32
  }
  func.func @transform_4(%arg0: i32) -> (i32, i32) {
    %c0_i32 = arith.constant 0 : i32
    %c0_i32_0 = arith.constant 0 : i32
    %c0_i32_1 = arith.constant 0 : i32
    return %c0_i32, %c0_i32_0 : i32, i32
  }
  func.func @transform_5(%arg0: i32) -> (i32, i32) {
    %c0_i32 = arith.constant 0 : i32
    %c0_i32_0 = arith.constant 0 : i32
    return %arg0, %c0_i32 : i32, i32
  }
  func.func @transform_6(%arg0: i32) -> (i32, i32) {
    %c0_i32 = arith.constant 0 : i32
    %c0_i32_0 = arith.constant 0 : i32
    return %arg0, %c0_i32 : i32, i32
  }
}

</mosaic_0001>

<bundles_post_ra>
// kernel: tpu_custom_call.1
= control target key start
LH: loop header
LB: loop body
LE: loop exit
PB: predicated region body
PF: predicated region fallthrough
CT: control target
= control target key end

     0   :  { %12 = vsyncpa [#allocation3], 0  ;;  %s697_s0 = inlined_call_operand.hbm [shape: f32[8,128], index: 0, kind: input, shape index: {}]   ;;  %s698_s1 = inlined_call_operand.hbm [shape: f32[128,128], index: 1, kind: input, shape index: {}]   ;;  %s699_s2 = inlined_call_operand.vmem [shape: f32[1,128], index: 2, kind: input, shape index: {}]   ;;  %s700_s3 = inlined_call_operand.hbm [shape: f32[128,128], index: 3, kind: input, shape index: {}]   ;;  %s701_s4 = inlined_call_operand.vmem [shape: f32[1,128], index: 4, kind: input, shape index: {}]   ;;  %s702_s5 = inlined_call_operand.hbm [shape: f32[8,128], index: 5, kind: output, shape index: {0}]   ;;  %s703_s6 = inlined_call_operand.hbm [shape: f32[8,128], index: 6, kind: output, shape index: {1}]  }
   0x1   :  { %13 = vsyncpa [#allocation6], 0 }
   0x2   :  { %14 = vsyncpa [#allocation4], 0 }
   0x3   :  { %15 = vsyncpa [#allocation10], 0  ;;  %s564_s21 = smov [#allocation5]   ;;  %s446_s25 = scalar_lea.hbm %s698_s1, 2048 }
   0x4   :  { %s31_s22 = sshll.u32 %s564_s21, 4  ;;  %p447_p0 = scmp.ne.s32.totalorder %s698_s1, %s446_s25  ;;  %s32_s22 = int_to_ptr.vmem [resolvable:$true] %s31_s22 }
   0x5   :  { %p450_p1 = scmp.lt.u32.totalorder %s446_s25, %s698_s1 }
   0x7   :  { %p452_p2 = pnand %p450_p1, %p447_p0 }
   0x9   :  { %455 = shalt.err (!%p452_p2)
}
   0xa   :  { %s456_s30 = scalar_lea.vmem %s32_s22, 2048  ;;  %p461_p4 = scmp.lt.s32.totalorder %s32_s22, %s32_s22 }
   0xb   :  { %p457_p3 = scmp.ne.s32.totalorder %s32_s22, %s456_s30  ;;  %p462_p5 = scmp.lt.s32.totalorder %s456_s30, %s456_s30 }
   0xd   :  { %p463_p6 = por %p462_p5, %p461_p4 }
   0xf   :  { %p464_p7 = pnand %p463_p6, %p457_p3 }
  0x11   :  { %467 = shalt.err (!%p464_p7)
}
  0x12   :  { %s565_s7 = smov 128   ;;  %s566_s8 = smov 8  }
  0x13   :  { %37 = dma.hbm_to_vmem [thread:$0]  %s698_s1, 2048, %s32_s22, [#allocation6], %s565_s7, %s565_s7, %s566_s8  }
  0x14   :  { %s567_s11 = smov [#allocation2]   ;;  %s568_s13 = smov [#allocation7]  }
  0x15   :  { %s22_s12 = sshll.u32 %s567_s11, 4  ;;  %s45_s14 = sshll.u32 %s568_s13, 4  ;;  %s23_s12 = int_to_ptr.vmem [resolvable:$true] %s22_s12  ;;  %s46_s14 = int_to_ptr.vmem [resolvable:$true] %s45_s14 }
  0x16   :  { %s468_s17 = scalar_lea.hbm %s697_s0, 128 }
  0x17   :  { %p469_p8 = scmp.ne.s32.totalorder %s697_s0, %s468_s17  ;;  %p472_p9 = scmp.lt.u32.totalorder %s468_s17, %s697_s0 }
  0x19   :  { %p474_p10 = pnand %p472_p9, %p469_p8 }
  0x1b   :  { %477 = shalt.err (!%p474_p10)
}
  0x1c   :  { %s478_s1 = scalar_lea.vmem %s23_s12, 128  ;;  %p483_p12 = scmp.lt.s32.totalorder %s23_s12, %s23_s12 }
  0x1d   :  { %p479_p11 = scmp.ne.s32.totalorder %s23_s12, %s478_s1  ;;  %p484_p13 = scmp.lt.s32.totalorder %s478_s1, %s478_s1 }
  0x1f   :  { %p485_p0 = por %p484_p13, %p483_p12 }
  0x21   :  { %p486_p1 = pnand %p485_p0, %p479_p11 }
  0x23   :  { %489 = shalt.err (!%p486_p1)
}
  0x24   :  { %25 = dma.hbm_to_vmem [thread:$0]  %s697_s0, 128, %s23_s12, [#allocation3]  }
  0x25   :  { %s490_s26 = scalar_lea.hbm %s700_s3, 2048 }
  0x26   :  { %p491_p2 = scmp.ne.s32.totalorder %s700_s3, %s490_s26  ;;  %p494_p3 = scmp.lt.u32.totalorder %s490_s26, %s700_s3 }
  0x28   :  { %p496_p4 = pnand %p494_p3, %p491_p2 }
  0x2a   :  { %499 = shalt.err (!%p496_p4)
}
  0x2b   :  { %s500_s9 = scalar_lea.vmem %s46_s14, 2048  ;;  %p505_p6 = scmp.lt.s32.totalorder %s46_s14, %s46_s14 }
  0x2c   :  { %p501_p5 = scmp.ne.s32.totalorder %s46_s14, %s500_s9  ;;  %p506_p7 = scmp.lt.s32.totalorder %s500_s9, %s500_s9 }
  0x2e   :  { %p507_p8 = por %p506_p7, %p505_p6 }
  0x30   :  { %p508_p9 = pnand %p507_p8, %p501_p5 }
  0x32   :  { %511 = shalt.err (!%p508_p9)
}
  0x33   :  { %51 = dma.hbm_to_vmem [thread:$0]  %s700_s3, 2048, %s46_s14, [#allocation6], %s565_s7, %s565_s7, %s566_s8  }
  0x34   :  { %556 = dma.done.wait [#allocation3], 128  }
  0x35   :  { %557 = vsyncadd [#allocation3], 4294967168 }
  0x36   :  { %558 = dma.done.wait [#allocation6], 4096  }
  0x37   :  { %559 = vsyncadd [#allocation6], 4294963200  ;;  %v569_v0 = vmov 0.0|0.0   ;;  %vm570_vm0 = vmmov 0   ;;  %v571_v1 = vmov 0.0   ;;  %v64_v2 = vld [vmem:[#allocation5] sm:$0xff] }
  0x38   :  { %388 = vmatprep.subr.bf16.mxu0 %v569_v0  ;;  %350 = vmatprep.mubr.msk.f32.mxu0 %vm570_vm0, %v571_v1  ;;  %v65_v3 = vld [vmem:[#allocation5 + $0x8] sm:$0xff]  ;;  %v66_v4 = vld [vmem:[#allocation5 + $0x10] sm:$0xff]  ;;  %v67_v6 = vld [vmem:[#allocation5 + $0x18] sm:$0xff]  ;;  %s572_s8 = smov [#allocation9]  }
  0x39   :  { %412 = vmatprep.subr.bf16.mxu1 %v569_v0  ;;  %385 = vmatprep.mubr.msk.f32.mxu1 %vm570_vm0, %v571_v1  ;;  %v389_v5 = vpack.c.bf16 %v65_v3, %v64_v2  ;;  %v392_v7 = vpack.c.bf16 %v67_v6, %v66_v4  ;;  %v68_v8 = vld [vmem:[#allocation5 + $0x20] sm:$0xff]  ;;  %v69_v9 = vld [vmem:[#allocation5 + $0x28] sm:$0xff]  ;;  %v160_v12 = vld [vmem:[#allocation7 + $0x10] sm:$0xff]  ;;  %s268_s11 = sshll.u32 %s572_s8, 4  ;;  %s269_s11 = int_to_ptr.vmem [resolvable:$true] %s268_s11 }
  0x3a   :  { %v158_v10 = vld [vmem:[#allocation7] sm:$0xff]  ;;  %v159_v11 = vld [vmem:[#allocation7 + $0x8] sm:$0xff]  ;;  %v161_v13 = vld [vmem:[#allocation7 + $0x18] sm:$0xff]  ;;  %v395_v14 = vpack.c.bf16 %v69_v9, %v68_v8  ;;  %s512_s12 = scalar_lea.vmem %s269_s11, 128  ;;  %p517_p11 = scmp.lt.s32.totalorder %s269_s11, %s269_s11 }
  0x3b   :  { %390 = vmatpush3.bf16.msra.mxu0 %v389_v5  ;;  %v413_v15 = vpack.c.bf16 %v159_v11, %v158_v10  ;;  %v70_v16 = vld [vmem:[#allocation5 + $0x30] sm:$0xff]  ;;  %v71_v17 = vld [vmem:[#allocation5 + $0x38] sm:$0xff]  ;;  %v416_v18 = vpack.c.bf16 %v161_v13, %v160_v12  ;;  %v162_v19 = vld [vmem:[#allocation7 + $0x20] sm:$0xff]  ;;  %p513_p10 = scmp.ne.s32.totalorder %s269_s11, %s512_s12  ;;  %p518_p12 = scmp.lt.s32.totalorder %s512_s12, %s512_s12 }
  0x3c   :  { %391 = vmatprep.subr.bf16.mxu0 %v569_v0  ;;  %v163_v20 = vld [vmem:[#allocation7 + $0x28] sm:$0xff]  ;;  %v398_v21 = vpack.c.bf16 %v71_v17, %v70_v16  ;;  %v72_v22 = vld [vmem:[#allocation5 + $0x40] sm:$0xff]  ;;  %v164_v25 = vld [vmem:[#allocation7 + $0x30] sm:$0xff] }
  0x3d   :  { %414 = vmatpush3.bf16.msra.mxu1 %v413_v15  ;;  %v73_v23 = vld [vmem:[#allocation5 + $0x48] sm:$0xff]  ;;  %v419_v24 = vpack.c.bf16 %v163_v20, %v162_v19  ;;  %v165_v26 = vld [vmem:[#allocation7 + $0x38] sm:$0xff]  ;;  %v74_v28 = vld [vmem:[#allocation5 + $0x50] sm:$0xff]  ;;  %p519_p13 = por %p518_p12, %p517_p11 }
  0x3e   :  { %415 = vmatprep.subr.bf16.mxu1 %v569_v0  ;;  %v401_v27 = vpack.c.bf16 %v73_v23, %v72_v22  ;;  %v75_v29 = vld [vmem:[#allocation5 + $0x58] sm:$0xff]  ;;  %v422_v30 = vpack.c.bf16 %v165_v26, %v164_v25  ;;  %v166_v31 = vld [vmem:[#allocation7 + $0x40] sm:$0xff]  ;;  %v167_v32 = vld [vmem:[#allocation7 + $0x48] sm:$0xff] }
  0x3f   :  { %393 = vmatpush3.bf16.msra.mxu0 %v392_v7  ;;  %v404_v33 = vpack.c.bf16 %v75_v29, %v74_v28  ;;  %v76_v34 = vld [vmem:[#allocation5 + $0x60] sm:$0xff]  ;;  %v77_v35 = vld [vmem:[#allocation5 + $0x68] sm:$0xff]  ;;  %v425_v36 = vpack.c.bf16 %v167_v32, %v166_v31  ;;  %v168_v37 = vld [vmem:[#allocation7 + $0x50] sm:$0xff]  ;;  %p520_p0 = pnand %p519_p13, %p513_p10 }
  0x40   :  { %394 = vmatprep.subr.bf16.mxu0 %v569_v0  ;;  %v169_v38 = vld [vmem:[#allocation7 + $0x58] sm:$0xff]  ;;  %v407_v39 = vpack.c.bf16 %v77_v35, %v76_v34  ;;  %v78_v40 = vld [vmem:[#allocation5 + $0x70] sm:$0xff]  ;;  %v170_v43 = vld [vmem:[#allocation7 + $0x60] sm:$0xff] }
  0x41   :  { %417 = vmatpush3.bf16.msra.mxu1 %v416_v18  ;;  %v79_v41 = vld [vmem:[#allocation5 + $0x78] sm:$0xff]  ;;  %v428_v42 = vpack.c.bf16 %v169_v38, %v168_v37  ;;  %v171_v44 = vld [vmem:[#allocation7 + $0x68] sm:$0xff]  ;;  %v172_v48 = vld [vmem:[#allocation7 + $0x70] sm:$0xff] }
  0x42   :  { %418 = vmatprep.subr.bf16.mxu1 %v569_v0  ;;  %v410_v45 = vpack.c.bf16 %v79_v41, %v78_v40  ;;  %v431_v46 = vpack.c.bf16 %v171_v44, %v170_v43  ;;  %v63_v47 = vld [vmem:[#allocation2] sm:$0xff] }
  0x43   :  { %396 = vmatpush3.bf16.msra.mxu0 %v395_v14  ;;  %v173_v49 = vld [vmem:[#allocation7 + $0x78] sm:$0xff] }
  0x44   :  { %397 = vmatprep.subr.bf16.mxu0 %v569_v0  ;;  %v434_v50 = vpack.c.bf16 %v173_v49, %v172_v48  ;;  %v282_v51 = vld [vmem:[%s699_s2] ss:$0 sm:$0xff] }
  0x45   :  { %420 = vmatpush3.bf16.msra.mxu1 %v419_v24 }
  0x46   :  { %421 = vmatprep.subr.bf16.mxu1 %v569_v0 }
  0x47   :  { %399 = vmatpush3.bf16.msra.mxu0 %v398_v21 }
  0x48   :  { %400 = vmatprep.subr.bf16.mxu0 %v569_v0 }
  0x49   :  { %423 = vmatpush3.bf16.msra.mxu1 %v422_v30 }
  0x4a   :  { %424 = vmatprep.subr.bf16.mxu1 %v569_v0 }
  0x4b   :  { %402 = vmatpush3.bf16.msra.mxu0 %v401_v27 }
  0x4c   :  { %403 = vmatprep.subr.bf16.mxu0 %v569_v0 }
  0x4d   :  { %426 = vmatpush3.bf16.msra.mxu1 %v425_v36 }
  0x4e   :  { %427 = vmatprep.subr.bf16.mxu1 %v569_v0 }
  0x4f   :  { %405 = vmatpush3.bf16.msra.mxu0 %v404_v33 }
  0x50   :  { %406 = vmatprep.subr.bf16.mxu0 %v569_v0 }
  0x51   :  { %429 = vmatpush3.bf16.msra.mxu1 %v428_v42 }
  0x52   :  { %430 = vmatprep.subr.bf16.mxu1 %v569_v0 }
  0x53   :  { %408 = vmatpush3.bf16.msra.mxu0 %v407_v39 }
  0x54   :  { %409 = vmatprep.subr.bf16.mxu0 %v569_v0 }
  0x55   :  { %432 = vmatpush3.bf16.msra.mxu1 %v431_v46 }
  0x56   :  { %433 = vmatprep.subr.bf16.mxu1 %v569_v0 }
  0x57   :  { %411 = vmatpush3.bf16.msra.mxu0 %v410_v45 }
  0x59   :  { %435 = vmatpush3.bf16.msra.mxu1 %v434_v50 }
  0x5a   :  { %351 = vmatmul.mubr.f32.vlgmr.msra.gmra.mrb[0].mxu0 %v63_v47 }
 0x12d   :  { %v153_v52 = vpop.f32.mrb[0].mxu0 }
 0x12e   :  { %v154_v53 = vadd.f32 %v282_v51, %v153_v52  ;;  %v352_v54 = vpop.f32.mrb[1].mxu0 }
 0x130   :  { %157 = vst [vmem:[#allocation9] sm:$0xff] %v154_v53  ;;  %386 = vmatmul.mubr.f32.vlgmr.msra.gmra.mrb[0].mxu1 %v154_v53 }
 0x131   :  { %523 = shalt.err (!%p520_p0)
}
 0x132   :  { %s524_s15 = scalar_lea.hbm %s703_s6, 128 }
 0x133   :  { %p525_p1 = scmp.ne.s32.totalorder %s703_s6, %s524_s15  ;;  %p528_p2 = scmp.lt.u32.totalorder %s524_s15, %s703_s6 }
 0x135   :  { %p530_p3 = pnand %p528_p2, %p525_p1 }
 0x137   :  { %533 = shalt.err (!%p530_p3)
}
 0x138   :  { %271 = dma.vmem_to_hbm [thread:$0]  %s269_s11, 128, %s703_s6, [#allocation10]   ;;  %v283_v55 = vld [vmem:[%s701_s4] ss:$0 sm:$0xff] }
 0x139   :  { %s573_s22 = smov [#allocation8]  }
 0x13a   :  { %s258_s23 = sshll.u32 %s573_s22, 4  ;;  %s259_s23 = int_to_ptr.vmem [resolvable:$true] %s258_s23 }
 0x13b   :  { %s534_s24 = scalar_lea.vmem %s259_s23, 128  ;;  %p539_p5 = scmp.lt.s32.totalorder %s259_s23, %s259_s23 }
 0x13c   :  { %p535_p4 = scmp.ne.s32.totalorder %s259_s23, %s534_s24  ;;  %p540_p6 = scmp.lt.s32.totalorder %s534_s24, %s534_s24 }
 0x13e   :  { %p541_p7 = por %p540_p6, %p539_p5 }
 0x140   :  { %p542_p8 = pnand %p541_p7, %p535_p4 }
 0x203   :  { %v247_v56 = vpop.f32.mrb[0].mxu1 }
 0x204   :  { %v248_v57 = vadd.f32 %v283_v55, %v247_v56  ;;  %v387_v58 = vpop.f32.mrb[1].mxu1 }
 0x206   :  { %251 = vst [vmem:[#allocation8] sm:$0xff] %v248_v57 }
 0x207   :  { %545 = shalt.err (!%p542_p8)
}
 0x208   :  { %s546_s26 = scalar_lea.hbm %s702_s5, 128 }
 0x209   :  { %p547_p9 = scmp.ne.s32.totalorder %s702_s5, %s546_s26  ;;  %p550_p10 = scmp.lt.u32.totalorder %s546_s26, %s702_s5 }
 0x20b   :  { %p552_p11 = pnand %p550_p10, %p547_p9 }
 0x20d   :  { %555 = shalt.err (!%p552_p11)
}
 0x20e   :  { %261 = dma.vmem_to_hbm [thread:$0]  %s259_s23, 128, %s702_s5, [#allocation4]  }
 0x20f   :  { %560 = dma.done.wait [#allocation4], 128  }
 0x210   :  { %561 = vsyncadd [#allocation4], 4294967168 }
 0x211   :  { %562 = dma.done.wait [#allocation10], 128  }
 0x212   :  { %563 = vsyncadd [#allocation10], 4294967168 }
 0x213   :  { %278 = vsyncpa [#allocation3], 1 }
 0x214   :  { %279 = vsyncpa [#allocation6], 1 }
 0x215   :  { %280 = vsyncpa [#allocation4], 1 }
 0x216   :  { %281 = vsyncpa [#allocation10], 1 }

</bundles_post_ra>
